<compile_context>
chip_gen: v6e
topology: v6e:2x2x1
jax: 0.10.0
libtpu: 0.0.40
codegen_flags: <defaults>
</compile_context>

<pallas_src>
import jax
import jax.numpy as jnp
import numpy as np
from jax import lax
from jax.experimental import pallas as pl
from jax.experimental.pallas import tpu as pltpu

_LANES = 128


def _cdiv(a, b):
    return -(-a // b)


def _round_up(x, m):
    return _cdiv(x, m) * m


def _vmem_budget():
    """Generation-aware (working-set budget, vmem_limit_bytes)."""
    try:
        cap = int(pltpu.get_tpu_info().vmem_capacity_bytes)
    except Exception:
        cap = 64 * 1024 * 1024          # conservative fallback (v7x-sized)
    budget = min(cap // 3, 24 * 1024 * 1024)   # one-hot + blocks working set
    limit = min(cap // 2, 64 * 1024 * 1024)    # scoped-VMEM request
    return budget, limit


def _batch_tile(n_b, cap=8):
    """Largest divisor of n_b that is <= cap (batches handled per grid step)."""
    for bt in range(min(n_b, cap), 0, -1):
        if n_b % bt == 0:
            return bt
    return 1


def _choose_tiling(n_at, l, n_b, b_tile, budget_bytes, max_tile_cols=None):
    """Pick a lane-dense tile of the flattened (atom, neighbor) axis.

    Returns (l_tile, l_pad, n_tiles); l_tile is always a multiple of 128.
    """
    # per lane column: iota + one-hot + intermediates (~16B*n_at) and the
    # double-buffered streamed blocks (~80B per batch in the batch tile).
    per_col = 16 * max(n_at, 8) + 80 * b_tile
    max_cols = max(_LANES, (budget_bytes // per_col) // _LANES * _LANES)
    if max_tile_cols is not None:
        max_cols = max(_LANES, min(max_cols, max_tile_cols // _LANES * _LANES))

    l_tile = min(_round_up(l, _LANES), max_cols)
    n_tiles = _cdiv(l, l_tile)

    # v7x has 2 TensorCores sharded over "parallel" grid axes: make sure a
    # single-molecule call still produces >= 2 grid steps when L is splittable.
    if (n_b // b_tile) * n_tiles < 2 and l_tile >= 2 * _LANES:
        l_tile = _round_up(_cdiv(l, 2), _LANES)
        n_tiles = _cdiv(l, l_tile)

    return l_tile, l_tile * n_tiles, n_tiles


def _detect_shared_table(neighbors):
    """True if the neighbor table is identical for every molecule in the batch."""
    try:
        nb = np.asarray(neighbors)
    except Exception:            # traced value -> cannot inspect, be safe
        return False
    return bool((nb == nb[:1]).all())


def _make_kernel(shared, return_vec):
    """Kernel factory: shared => one-hot built once per tile, reused over batch."""

    def kernel(pos_ref, nbr_ref, cen_ref, mask_ref, *out_refs):
        dist_ref = out_refs[0]
        dvec_ref = out_refs[1] if return_vec else None
        n_bt = pos_ref.shape[0]            # batches handled this grid step
        n_at = pos_ref.shape[2]
        l_tile = dist_ref.shape[-1]

        row = lax.broadcasted_iota(jnp.int32, (n_at, l_tile), 0)
        onehot_shared = None
        if shared:
            # nbr_ref block is (1, 1, l_tile): build the gather matrix once.
            onehot_shared = (row == nbr_ref[0]).astype(jnp.float32)

        for b in range(n_bt):              # small static unrolled batch loop
            onehot = (onehot_shared if shared
                      else (row == nbr_ref[b]).astype(jnp.float32))
            # gathered(3, l_tile) = pos^T(3, n_at) @ onehot(n_at, l_tile)
            gathered = jnp.dot(pos_ref[b], onehot,
                               preferred_element_type=jnp.float32,
                               precision=lax.Precision.HIGHEST)
            dvec = gathered - cen_ref[b]                       # (3, l_tile)
            sumsq = jnp.sum(dvec * dvec, axis=0, keepdims=True)  # (1, l_tile)
            valid = mask_ref[b] != 0.0

            if return_vec:
                pos_sq = sumsq > 0.0
                # one EUP rsqrt replaces sqrt + divide
                inv = lax.rsqrt(jnp.where(pos_sq, sumsq, 1.0))
                dist = jnp.where(pos_sq, sumsq * inv, 0.0)
                dist_ref[b] = jnp.where(valid, dist, 0.0)
                # torch: denom = dist where mask!=0 else 1 -> scale = 1/denom
                # (valid zero-distance entries are guarded to scale=1, not nan)
                scale = jnp.where(valid & pos_sq, inv, 1.0)
                dvec_ref[b] = dvec * scale
            else:
                dist_ref[b] = jnp.where(valid, jnp.sqrt(sumsq), 0.0)

    return kernel


def atom_distances_pallas(positions, neighbors, neighbor_mask=None,
                          return_unit_vec=False, shared_neighbor_table=None,
                          max_tile_cols=None):
    """Pallas implementation of AtomDistances.forward (normalize_vecs=True)."""
    positions = positions.astype(jnp.float32)
    neighbors = neighbors.astype(jnp.int32)
    n_b, n_at, _ = positions.shape
    n_nbh = neighbors.shape[-1]
    l = n_at * n_nbh

    if neighbor_mask is None:
        mask = jnp.ones((n_b, n_at, n_nbh), jnp.float32)
    else:
        mask = neighbor_mask.astype(jnp.float32)

    if shared_neighbor_table is None:
        shared_neighbor_table = _detect_shared_table(neighbors)
    shared = bool(shared_neighbor_table)

    b_tile = _batch_tile(n_b)
    budget, vmem_limit = _vmem_budget()
    l_tile, l_pad, n_tiles = _choose_tiling(n_at, l, n_b, b_tile, budget,
                                            max_tile_cols)

    # lane-dense, coordinate-plane layouts (layout plumbing is wrapper-side)
    pos_t = jnp.transpose(positions, (0, 2, 1))          # (N_b, 3, N_at)
    pos_center = jnp.repeat(pos_t, n_nbh, axis=2)        # (N_b, 3, L)
    mask_flat = mask.reshape(n_b, 1, l)                  # (N_b, 1, L)
    if shared:
        nbr_flat = neighbors[:1].reshape(1, 1, l)        # (1, 1, L)
    else:
        nbr_flat = neighbors.reshape(n_b, 1, l)          # (N_b, 1, L)

    pad = l_pad - l
    if pad:
        nbr_flat = jnp.pad(nbr_flat, ((0, 0), (0, 0), (0, pad)))
        mask_flat = jnp.pad(mask_flat, ((0, 0), (0, 0), (0, pad)))
        pos_center = jnp.pad(pos_center, ((0, 0), (0, 0), (0, pad)))

    grid = (n_b // b_tile, n_tiles)
    pos_spec = pl.BlockSpec((b_tile, 3, n_at), lambda b, t: (b, 0, 0))
    if shared:
        nbr_spec = pl.BlockSpec((1, 1, l_tile), lambda b, t: (0, 0, t))
    else:
        nbr_spec = pl.BlockSpec((b_tile, 1, l_tile), lambda b, t: (b, 0, t))
    cen_spec = pl.BlockSpec((b_tile, 3, l_tile), lambda b, t: (b, 0, t))
    mask_spec = pl.BlockSpec((b_tile, 1, l_tile), lambda b, t: (b, 0, t))
    dist_spec = pl.BlockSpec((b_tile, 1, l_tile), lambda b, t: (b, 0, t))

    cparams = pltpu.CompilerParams(
        dimension_semantics=("parallel", "parallel"),
        vmem_limit_bytes=int(vmem_limit))

    kernel = _make_kernel(shared, return_unit_vec)

    if return_unit_vec:
        dvec_spec = pl.BlockSpec((b_tile, 3, l_tile), lambda b, t: (b, 0, t))
        dist_flat, dvec_flat = pl.pallas_call(
            kernel,
            out_shape=(jax.ShapeDtypeStruct((n_b, 1, l_pad), jnp.float32),
                       jax.ShapeDtypeStruct((n_b, 3, l_pad), jnp.float32)),
            grid_spec=pltpu.PrefetchScalarGridSpec(
                num_scalar_prefetch=0,
                grid=grid,
                in_specs=[pos_spec, nbr_spec, cen_spec, mask_spec],
                out_specs=[dist_spec, dvec_spec]),
            compiler_params=cparams,
        )(pos_t, nbr_flat, pos_center, mask_flat)
        dist = dist_flat[:, 0, :l].reshape(n_b, n_at, n_nbh)
        dvec = jnp.transpose(
            dvec_flat[:, :, :l].reshape(n_b, 3, n_at, n_nbh), (0, 2, 3, 1))
        return dist, dvec
    else:
        dist_flat = pl.pallas_call(
            kernel,
            out_shape=jax.ShapeDtypeStruct((n_b, 1, l_pad), jnp.float32),
            grid_spec=pltpu.PrefetchScalarGridSpec(
                num_scalar_prefetch=0,
                grid=grid,
                in_specs=[pos_spec, nbr_spec, cen_spec, mask_spec],
                out_specs=dist_spec),
            compiler_params=cparams,
        )(pos_t, nbr_flat, pos_center, mask_flat)
        return dist_flat[:, 0, :l].reshape(n_b, n_at, n_nbh)


class AtomDistances:
    """JAX/Pallas port of lightMolNet AtomDistances (no learnable params)."""

    def __init__(self, return_unit_vec=False):
        self.return_unit_vec = return_unit_vec

    def __call__(self, positions, neighbors, cell=None, cell_offsets=None,
                 neighbor_mask=None):
        # TODO(synk): cell / cell_offsets (periodic images) not supported.
        return atom_distances_pallas(positions, neighbors,
                                     neighbor_mask=neighbor_mask,
                                     return_unit_vec=self.return_unit_vec)


# ---------------------------------------------------------------------------
# Pure-JAX reference (mirrors the torch semantics) for verification.
# ---------------------------------------------------------------------------
def _reference(positions, neighbors, neighbor_mask, return_unit_vec):
    pos_nbr = jax.vmap(lambda p, n: p[n])(positions, neighbors)   # (B, A, N, 3)
    dvec = pos_nbr - positions[:, :, None, :]
    dist = jnp.linalg.norm(dvec, axis=-1)
    masked = jnp.where(neighbor_mask != 0, dist, 0.0)
    if return_unit_vec:
        denom = jnp.where(neighbor_mask != 0, dist, 1.0)
        return masked, dvec / denom[..., None]
    return masked


def _make_inputs(key, n_b, n_at):
    n_nbh = n_at - 1
    k_pos, k_mask = jax.random.split(key)
    positions = jax.random.normal(k_pos, (n_b, n_at, 3), dtype=jnp.float32)
    # neighbors: for atom i, all other atoms j != i (schnet-style shared table)
    full = np.tile(np.arange(n_at), (n_at, 1))
    nbr_single = full[~np.eye(n_at, dtype=bool)].reshape(n_at, n_nbh)
    neighbors = jnp.asarray(np.tile(nbr_single[None], (n_b, 1, 1)), dtype=jnp.int32)
    neighbor_mask = (jax.random.uniform(k_mask, (n_b, n_at, n_nbh)) > 0.2
                     ).astype(jnp.float32)
    return positions, neighbors, neighbor_mask


def _check(positions, neighbors, neighbor_mask, shared=None, max_tile_cols=None):
    dist = atom_distances_pallas(positions, neighbors, neighbor_mask,
                                 return_unit_vec=False,
                                 shared_neighbor_table=shared,
                                 max_tile_cols=max_tile_cols)
    jax.block_until_ready(dist)
    ref_d = _reference(positions, neighbors, neighbor_mask, False)
    np.testing.assert_allclose(np.asarray(dist), np.asarray(ref_d),
                               rtol=1e-5, atol=1e-5)
    dist2, dvec2 = atom_distances_pallas(positions, neighbors, neighbor_mask,
                                         return_unit_vec=True,
                                         shared_neighbor_table=shared,
                                         max_tile_cols=max_tile_cols)
    jax.block_until_ready((dist2, dvec2))
    ref_d2, ref_v2 = _reference(positions, neighbors, neighbor_mask, True)
    np.testing.assert_allclose(np.asarray(dist2), np.asarray(ref_d2),
                               rtol=1e-5, atol=1e-5)
    np.testing.assert_allclose(np.asarray(dvec2), np.asarray(ref_v2),
                               rtol=1e-5, atol=1e-5)


if __name__ == "__main__":
    key = jax.random.PRNGKey(0)
    k1, k2 = jax.random.split(key)

    # Case 1: small molecule, single lane-dense tile, shared-neighbor-table
    # path auto-detected (module-default configuration).
    positions, neighbors, neighbor_mask = _make_inputs(k1, n_b=2, n_at=8)
    layer = AtomDistances(return_unit_vec=False)
    dist = layer(positions, neighbors, neighbor_mask=neighbor_mask)
    jax.block_until_ready(dist)
    np.testing.assert_allclose(
        np.asarray(dist),
        np.asarray(_reference(positions, neighbors, neighbor_mask, False)),
        rtol=1e-5, atol=1e-5)
    layer_uv = AtomDistances(return_unit_vec=True)
    dist_uv, dvec_uv = layer_uv(positions, neighbors, neighbor_mask=neighbor_mask)
    jax.block_until_ready((dist_uv, dvec_uv))
    ref_d, ref_v = _reference(positions, neighbors, neighbor_mask, True)
    np.testing.assert_allclose(np.asarray(dist_uv), np.asarray(ref_d),
                               rtol=1e-5, atol=1e-5)
    np.testing.assert_allclose(np.asarray(dvec_uv), np.asarray(ref_v),
                               rtol=1e-5, atol=1e-5)

    # Case 2: force the general (per-batch one-hot) kernel plus the multi-tile
    # lane-padding path with a tiny tile cap.
    positions2, neighbors2, neighbor_mask2 = _make_inputs(k2, n_b=2, n_at=16)
    _check(positions2, neighbors2, neighbor_mask2, shared=False,
           max_tile_cols=128)

    print("KERNEL_OK")
</pallas_src>

<mosaic_0001>
module attributes {stable_mosaic.version = 11 : i64} {
  func.func @kernel(%arg0: i32, %arg1: i32, %arg2: memref<2x3x8xf32, #tpu.memory_space<vmem>>, %arg3: memref<1x1x128xi32, #tpu.memory_space<vmem>>, %arg4: memref<2x3x128xf32, #tpu.memory_space<vmem>>, %arg5: memref<2x1x128xf32, #tpu.memory_space<vmem>>, %arg6: memref<2x1x128xf32, #tpu.memory_space<vmem>>) attributes {dimension_semantics = [#tpu.dimension_semantics<parallel>, #tpu.dimension_semantics<parallel>], iteration_bounds = array<i64: 1, 1>, scalar_prefetch = 0 : i64, scratch_operands = 0 : i64, tpu.core_type = #tpu.core_type<tc>, window_params = [{transform_indices = @transform_0, window_bounds = array<i64: 2, 3, 8>}, {transform_indices = @transform_1, window_bounds = array<i64: 1, 1, 128>}, {transform_indices = @transform_2, window_bounds = array<i64: 2, 3, 128>}, {transform_indices = @transform_3, window_bounds = array<i64: 2, 1, 128>}, {transform_indices = @transform_4, window_bounds = array<i64: 2, 1, 128>}]} {
    %0 = tpu.iota {dimensions = array<i32: 0>} : vector<8x128xi32>
    %c0 = arith.constant 0 : index
    %c0_0 = arith.constant 0 : index
    %c0_1 = arith.constant 0 : index
    %1 = vector.load %arg3[%c0, %c0_0, %c0_1] : memref<1x1x128xi32, #tpu.memory_space<vmem>>, vector<1x1x128xi32>
    %2 = vector.shape_cast %1 : vector<1x1x128xi32> to vector<1x128xi32>
    %3 = vector.broadcast %2 : vector<1x128xi32> to vector<8x128xi32>
    %4 = arith.cmpi eq, %0, %3 : vector<8x128xi32>
    %5 = arith.extui %4 : vector<8x128xi1> to vector<8x128xi32>
    %6 = arith.sitofp %5 : vector<8x128xi32> to vector<8x128xf32>
    %c0_2 = arith.constant 0 : index
    %c0_3 = arith.constant 0 : index
    %c0_4 = arith.constant 0 : index
    %7 = vector.load %arg2[%c0_2, %c0_3, %c0_4] : memref<2x3x8xf32, #tpu.memory_space<vmem>>, vector<1x3x8xf32>
    %8 = vector.shape_cast %7 : vector<1x3x8xf32> to vector<3x8xf32>
    %cst = arith.constant dense<0.000000e+00> : vector<3x128xf32>
    %9 = tpu.matmul %8, %6, %cst {dimension_numbers = #tpu.dot_dimension_numbers<[1], [0], [0], [1], [0, 0, 1, 1], [], []>, precision = #tpu.contract_precision<fp32>} : vector<3x8xf32>, vector<8x128xf32>, vector<3x128xf32> -> vector<3x128xf32>
    %c0_5 = arith.constant 0 : index
    %c0_6 = arith.constant 0 : index
    %c0_7 = arith.constant 0 : index
    %10 = vector.load %arg4[%c0_5, %c0_6, %c0_7] : memref<2x3x128xf32, #tpu.memory_space<vmem>>, vector<1x3x128xf32>
    %11 = vector.shape_cast %10 : vector<1x3x128xf32> to vector<3x128xf32>
    %12 = arith.subf %9, %11 : vector<3x128xf32>
    %13 = arith.mulf %12, %12 : vector<3x128xf32>
    %cst_8 = arith.constant dense<0.000000e+00> : vector<128xf32>
    %14 = vector.multi_reduction <add>, %13, %cst_8 [0] : vector<3x128xf32> to vector<128xf32>
    %15 = vector.shape_cast %14 : vector<128xf32> to vector<1x128xf32>
    %c0_9 = arith.constant 0 : index
    %c0_10 = arith.constant 0 : index
    %c0_11 = arith.constant 0 : index
    %16 = vector.load %arg5[%c0_9, %c0_10, %c0_11] : memref<2x1x128xf32, #tpu.memory_space<vmem>>, vector<1x1x128xf32>
    %17 = vector.shape_cast %16 : vector<1x1x128xf32> to vector<1x128xf32>
    %cst_12 = arith.constant 0.000000e+00 : f32
    %18 = vector.broadcast %cst_12 : f32 to vector<1x128xf32>
    %19 = arith.cmpf one, %17, %18 : vector<1x128xf32>
    %20 = math.sqrt %15 : vector<1x128xf32>
    %cst_13 = arith.constant 0.000000e+00 : f32
    %21 = vector.broadcast %cst_13 : f32 to vector<1x128xf32>
    %22 = arith.select %19, %20, %21 : vector<1x128xi1>, vector<1x128xf32>
    %c0_14 = arith.constant 0 : index
    %c0_15 = arith.constant 0 : index
    %c0_16 = arith.constant 0 : index
    %23 = vector.load %arg6[%c0_14, %c0_15, %c0_16] : memref<2x1x128xf32, #tpu.memory_space<vmem>>, vector<1x1x128xf32>
    %24 = vector.shape_cast %23 : vector<1x1x128xf32> to vector<1x128xf32>
    %25 = vector.shape_cast %22 : vector<1x128xf32> to vector<1x1x128xf32>
    tpu.vector_store %arg6[%c0_14, %c0_15, %c0_16], %25 {strides = array<i32>} : memref<2x1x128xf32, #tpu.memory_space<vmem>>, vector<1x1x128xf32>,
    %c1 = arith.constant 1 : index
    %c0_17 = arith.constant 0 : index
    %c0_18 = arith.constant 0 : index
    %26 = vector.load %arg2[%c1, %c0_17, %c0_18] : memref<2x3x8xf32, #tpu.memory_space<vmem>>, vector<1x3x8xf32>
    %27 = vector.shape_cast %26 : vector<1x3x8xf32> to vector<3x8xf32>
    %cst_19 = arith.constant dense<0.000000e+00> : vector<3x128xf32>
    %28 = tpu.matmul %27, %6, %cst_19 {dimension_numbers = #tpu.dot_dimension_numbers<[1], [0], [0], [1], [0, 0, 1, 1], [], []>, precision = #tpu.contract_precision<fp32>} : vector<3x8xf32>, vector<8x128xf32>, vector<3x128xf32> -> vector<3x128xf32>
    %c1_20 = arith.constant 1 : index
    %c0_21 = arith.constant 0 : index
    %c0_22 = arith.constant 0 : index
    %29 = vector.load %arg4[%c1_20, %c0_21, %c0_22] : memref<2x3x128xf32, #tpu.memory_space<vmem>>, vector<1x3x128xf32>
    %30 = vector.shape_cast %29 : vector<1x3x128xf32> to vector<3x128xf32>
    %31 = arith.subf %28, %30 : vector<3x128xf32>
    %32 = arith.mulf %31, %31 : vector<3x128xf32>
    %cst_23 = arith.constant dense<0.000000e+00> : vector<128xf32>
    %33 = vector.multi_reduction <add>, %32, %cst_23 [0] : vector<3x128xf32> to vector<128xf32>
    %34 = vector.shape_cast %33 : vector<128xf32> to vector<1x128xf32>
    %c1_24 = arith.constant 1 : index
    %c0_25 = arith.constant 0 : index
    %c0_26 = arith.constant 0 : index
    %35 = vector.load %arg5[%c1_24, %c0_25, %c0_26] : memref<2x1x128xf32, #tpu.memory_space<vmem>>, vector<1x1x128xf32>
    %36 = vector.shape_cast %35 : vector<1x1x128xf32> to vector<1x128xf32>
    %cst_27 = arith.constant 0.000000e+00 : f32
    %37 = vector.broadcast %cst_27 : f32 to vector<1x128xf32>
    %38 = arith.cmpf one, %36, %37 : vector<1x128xf32>
    %39 = math.sqrt %34 : vector<1x128xf32>
    %cst_28 = arith.constant 0.000000e+00 : f32
    %40 = vector.broadcast %cst_28 : f32 to vector<1x128xf32>
    %41 = arith.select %38, %39, %40 : vector<1x128xi1>, vector<1x128xf32>
    %c1_29 = arith.constant 1 : index
    %c0_30 = arith.constant 0 : index
    %c0_31 = arith.constant 0 : index
    %42 = vector.load %arg6[%c1_29, %c0_30, %c0_31] : memref<2x1x128xf32, #tpu.memory_space<vmem>>, vector<1x1x128xf32>
    %43 = vector.shape_cast %42 : vector<1x1x128xf32> to vector<1x128xf32>
    %44 = vector.shape_cast %41 : vector<1x128xf32> to vector<1x1x128xf32>
    tpu.vector_store %arg6[%c1_29, %c0_30, %c0_31], %44 {strides = array<i32>} : memref<2x1x128xf32, #tpu.memory_space<vmem>>, vector<1x1x128xf32>,
    return
  }
  func.func @transform_0(%arg0: i32, %arg1: i32) -> (i32, i32, i32) {
    %c0_i32 = arith.constant 0 : i32
    %c0_i32_0 = arith.constant 0 : i32
    %c0_i32_1 = arith.constant 0 : i32
    return %arg0, %c0_i32, %c0_i32_0 : i32, i32, i32
  }
  func.func @transform_1(%arg0: i32, %arg1: i32) -> (i32, i32, i32) {
    %c0_i32 = arith.constant 0 : i32
    %c0_i32_0 = arith.constant 0 : i32
    %c0_i32_1 = arith.constant 0 : i32
    return %c0_i32, %c0_i32_0, %arg1 : i32, i32, i32
  }
  func.func @transform_2(%arg0: i32, %arg1: i32) -> (i32, i32, i32) {
    %c0_i32 = arith.constant 0 : i32
    %c0_i32_0 = arith.constant 0 : i32
    return %arg0, %c0_i32, %arg1 : i32, i32, i32
  }
  func.func @transform_3(%arg0: i32, %arg1: i32) -> (i32, i32, i32) {
    %c0_i32 = arith.constant 0 : i32
    %c0_i32_0 = arith.constant 0 : i32
    return %arg0, %c0_i32, %arg1 : i32, i32, i32
  }
  func.func @transform_4(%arg0: i32, %arg1: i32) -> (i32, i32, i32) {
    %c0_i32 = arith.constant 0 : i32
    %c0_i32_0 = arith.constant 0 : i32
    return %arg0, %c0_i32, %arg1 : i32, i32, i32
  }
}

</mosaic_0001>

<bundles_post_ra>
// kernel: tpu_custom_call.1
= control target key start
LH: loop header
LB: loop body
LE: loop exit
PB: predicated region body
PF: predicated region fallthrough
CT: control target
= control target key end

     0   :  { %v18_v0 = vlaneseq  ;;  %v1119_v2 = vmov 0.0   ;;  %vm1120_vm0 = vmmov 0   ;;  %vm29_vm1 = vcmask 64512   ;;  %s1231_s0 = inlined_call_operand.vmem [shape: f32[2,3,8], index: 0, kind: input, shape index: {}]   ;;  %s1232_s1 = inlined_call_operand.vmem [shape: s32[1,1,128], index: 1, kind: input, shape index: {}]   ;;  %s1233_s2 = inlined_call_operand.vmem [shape: f32[2,3,128], index: 2, kind: input, shape index: {}]   ;;  %s1234_s3 = inlined_call_operand.vmem [shape: f32[2,1,128], index: 3, kind: input, shape index: {}]   ;;  %s1235_s4 = inlined_call_operand.hbm [shape: f32[2,1,128], index: 4, kind: output, shape index: {}]  }
   0x1   :  { %v992_v1 = vld [vmem:[%s1232_s1] ss:$0 sm:$0xff]  ;;  %1027 = vmatprep.subr.mxu0 %v1119_v2  ;;  %1029 = vmatprep.mubr.msk.f32.mxu0 %vm1120_vm0, %v1119_v2  ;;  %v997_v4 = vld [vmem:[%s1231_s0 + $0x4] sm:$0x7] }
   0x2   :  { %v28_v3 = vld [vmem:[%s1231_s0] sm:$0x7]  ;;  %v19_v5 = vshrl.u32 %v18_v0, 7  ;;  %v504_v7 = vsel %vm29_vm1, %v997_v4, 0  ;;  %1032 = vmatprep.subr.mxu1 %v1119_v2  ;;  %1034 = vmatprep.mubr.msk.f32.mxu1 %vm1120_vm0, %v1119_v2 }
   0x3   :  { %v31_v6 = vsel %vm29_vm1, %v28_v3, 0 }
   0x4   :  { %9 = vsyncpa [#allocation3], 0  ;;  %v99_v8 = vand.u32 4294901760, %v31_v6  ;;  %vm1165_vm2 = vcmp.eq.s32.totalorder %v19_v5, %v992_v1  ;;  %v1121_v10 = vmov 1.0   ;;  %v572_v12 = vand.u32 4294901760, %v504_v7  ;;  %s1122_s26 = smov [#allocation2]  }
   0x5   :  { %1028 = vmatpush3.msk.msra.mxu0 %vm1165_vm2, %v1121_v10  ;;  %v993_v13 = vsel %vm1165_vm2, 1.0, %v1119_v2  ;;  %v479_v40 = vld [vmem:[%s1233_s2] sm:$0x7]  ;;  %vm482_vm3 = vcmask 1042432   ;;  %v1001_v0 = vld [vmem:[%s1233_s2 + $0x4] sm:$0x7] }
   0x6   :  { %v100_v11 = vsub.f32 %v31_v6, %v99_v8  ;;  %1037 = vmatprep.subr.mxu0 %v1119_v2  ;;  %v141_v14 = vsub.f32 %v993_v13, %v993_v13  ;;  %v573_v18 = vsub.f32 %v504_v7, %v572_v12  ;;  %s981_s27 = sshll.u32 %s1122_s26, 4  ;;  %s982_s27 = int_to_ptr.vmem [resolvable:$true] %s981_s27 }
   0x7   :  { %s1097_s28 = scalar_lea.vmem %s982_s27, 32  ;;  %p1102_p1 = scmp.lt.s32.totalorder %s982_s27, %s982_s27 }
   0x8   :  { %v101_v15 = vand.u32 4294901760, %v100_v11  ;;  %v142_v16 = vand.u32 4294901760, %v141_v14  ;;  %v574_v22 = vand.u32 4294901760, %v573_v18  ;;  %p1098_p0 = scmp.ne.s32.totalorder %s982_s27, %s1097_s28  ;;  %p1103_p2 = scmp.lt.s32.totalorder %s1097_s28, %s1097_s28 }
   0xa   :  { %v102_v17 = vsub.f32 %v100_v11, %v101_v15  ;;  %v143_v19 = vsub.f32 %v141_v14, %v142_v16  ;;  %v575_v23 = vsub.f32 %v573_v18, %v574_v22  ;;  %p1104_p3 = por %p1103_p2, %p1102_p1 }
   0xc   :  { %v103_v20 = vand.u32 4294901760, %v102_v17  ;;  %v144_v21 = vand.u32 4294901760, %v143_v19  ;;  %v576_v24 = vand.u32 4294901760, %v575_v23  ;;  %p1105_p4 = pnand %p1104_p3, %p1098_p0 }
   0xe   :  { %1030 = vmatmul.mubr.f32.vlgmr.msra.gmra.mxu0 %v103_v20  ;;  %1033 = vmatpush3.msra.mxu1 %v144_v21 }
   0xf   :  { %1038 = vmatpush3.msra.mxu0 %v141_v14  ;;  %1035 = vmatmul.mubr.f32.vlgmr.msra.gmra.mxu1 %v99_v8 }
  0x10   :  { %1039 = vmatprep.mubr.msk.f32.mxu0 %vm1120_vm0, %v1119_v2  ;;  %1042 = vmatprep.subr.mxu1 %v1119_v2 }
  0x11   :  { %1047 = vmatprep.subr.mxu0 %v1119_v2  ;;  %1043 = vmatpush3.msk.msra.mxu1 %vm1165_vm2, %v1121_v10 }
  0x12   :  { %1040 = vmatmul.mubr.f32.vlgmr.msra.gmra.mxu0 %v100_v11  ;;  %1044 = vmatprep.mubr.msk.f32.mxu1 %vm1120_vm0, %v1119_v2 }
  0x13   :  { %1048 = vmatpush3.msra.mxu0 %v142_v16  ;;  %1045 = vmatmul.mubr.f32.vlgmr.msra.gmra.mxu1 %v101_v15  ;;  %v490_v15 = vld [vmem:[%s1234_s3] sm:$0x1] }
  0x14   :  { %1049 = vmatprep.mubr.msk.f32.mxu0 %vm1120_vm0, %v1119_v2  ;;  %1052 = vmatprep.subr.mxu1 %v1119_v2  ;;  %vm491_vm4 = vcmp.ne.f32.partialorder %v490_v15, 0.0 }
  0x15   :  { %1057 = vmatprep.subr.mxu0 %v1119_v2  ;;  %1053 = vmatpush3.msk.msra.mxu1 %vm1165_vm2, %v1121_v10 }
  0x16   :  { %1050 = vmatmul.mubr.f32.vlgmr.msra.gmra.mxu0 %v99_v8  ;;  %1054 = vmatprep.mubr.msk.f32.mxu1 %vm1120_vm0, %v1119_v2 }
  0x17   :  { %1058 = vmatpush3.msk.msra.mxu0 %vm1165_vm2, %v1121_v10  ;;  %1055 = vmatmul.mubr.f32.vlgmr.msra.gmra.mxu1 %v99_v8 }
  0x18   :  { %1059 = vmatprep.mubr.msk.f32.mxu0 %vm1120_vm0, %v1119_v2  ;;  %1062 = vmatprep.subr.mxu1 %v1119_v2 }
  0x19   :  { %1067 = vmatprep.subr.mxu0 %v1119_v2  ;;  %1063 = vmatpush3.msra.mxu1 %v144_v21 }
  0x1a   :  { %1060 = vmatmul.mubr.f32.vlgmr.msra.gmra.mxu0 %v576_v24  ;;  %1064 = vmatprep.mubr.msk.f32.mxu1 %vm1120_vm0, %v1119_v2 }
  0x1b   :  { %1068 = vmatpush3.msra.mxu0 %v141_v14  ;;  %1065 = vmatmul.mubr.f32.vlgmr.msra.gmra.mxu1 %v572_v12 }
  0x1c   :  { %1069 = vmatprep.mubr.msk.f32.mxu0 %vm1120_vm0, %v1119_v2  ;;  %1072 = vmatprep.subr.mxu1 %v1119_v2 }
  0x1d   :  { %1077 = vmatprep.subr.mxu0 %v1119_v2  ;;  %1073 = vmatpush3.msk.msra.mxu1 %vm1165_vm2, %v1121_v10 }
  0x1e   :  { %1070 = vmatmul.mubr.f32.vlgmr.msra.gmra.mxu0 %v573_v18  ;;  %1074 = vmatprep.mubr.msk.f32.mxu1 %vm1120_vm0, %v1119_v2 }
  0x1f   :  { %1078 = vmatpush3.msra.mxu0 %v142_v16  ;;  %1075 = vmatmul.mubr.f32.vlgmr.msra.gmra.mxu1 %v574_v22  ;;  %v1002_v22 = vld [vmem:[%s1234_s3 + $0x1] sm:$0x1] }
  0x20   :  { %1079 = vmatprep.mubr.msk.f32.mxu0 %vm1120_vm0, %v1119_v2  ;;  %1082 = vmatprep.subr.mxu1 %v1119_v2  ;;  %vm965_vm7 = vcmp.ne.f32.partialorder %v1002_v22, 0.0 }
  0x21   :  { %1084 = vmatprep.mubr.msk.f32.mxu1 %vm1120_vm0, %v1119_v2  ;;  %1083 = vmatpush3.msk.msra.mxu1 %vm1165_vm2, %v1121_v10 }
  0x22   :  { %1080 = vmatmul.mubr.f32.vlgmr.msra.gmra.mxu0 %v572_v12 }
  0x23   :  { %1085 = vmatmul.mubr.f32.vlgmr.msra.gmra.mxu1 %v572_v12 }
  0xce   :  { %v105_v25 = vpop.f32.mrf.mxu0 }
  0xcf   :  { %v181_v27 = vpop.f32.mrf.mxu1 }
  0xd0   :  { %v1031_v26 = vpop.f32.mrf.mxu0  ;;  %v182_v28 = vadd.f32 %v181_v27, %v105_v25 }
  0xd1   :  { %v1036_v30 = vpop.f32.mrf.mxu1 }
  0xd2   :  { %v255_v29 = vpop.f32.mrf.mxu0 }
  0xd3   :  { %v256_v31 = vadd.f32 %v255_v29, %v182_v28  ;;  %v329_v33 = vpop.f32.mrf.mxu1 }
  0xd4   :  { %v1041_v32 = vpop.f32.mrf.mxu0 }
  0xd5   :  { %v330_v34 = vadd.f32 %v329_v33, %v256_v31  ;;  %v1046_v36 = vpop.f32.mrf.mxu1 }
  0xd6   :  { %v403_v35 = vpop.f32.mrf.mxu0 }
  0xd7   :  { %v404_v37 = vadd.f32 %v403_v35, %v330_v34  ;;  %v475_v39 = vpop.f32.mrf.mxu1 }
  0xd8   :  { %v1051_v38 = vpop.f32.mrf.mxu0 }
  0xd9   :  { %v476_v41 = vadd.f32 %v475_v39, %v404_v37  ;;  %v1056_v43 = vpop.f32.mrf.mxu1 }
  0xda   :  { %v578_v42 = vpop.f32.mrf.mxu0 }
  0xdb   :  { %v480_v44 = vsub.f32 %v476_v41, %v479_v40  ;;  %v654_v46 = vpop.f32.mrf.mxu1 }
  0xdc   :  { %v1061_v45 = vpop.f32.mrf.mxu0  ;;  %v655_v48 = vadd.f32 %v654_v46, %v578_v42 }
  0xdd   :  { %v481_v47 = vmul.f32 %v480_v44, %v480_v44  ;;  %v1066_v50 = vpop.f32.mrf.mxu1 }
  0xde   :  { %v728_v49 = vpop.f32.mrf.mxu0 }
  0xdf   :  { %v483_v51 = vsel %vm482_vm3, %v481_v47, 0.0  ;;  %v729_v52 = vadd.f32 %v728_v49, %v655_v48  ;;  %v802_v55 = vpop.f32.mrf.mxu1 }
  0xe0   :  { %v484_v53 = vrot.slane %v483_v51, 4  ;;  %v1071_v54 = vpop.f32.mrf.mxu0 }
  0xe1   :  { %v803_v56 = vadd.f32 %v802_v55, %v729_v52  ;;  %v1076_v59 = vpop.f32.mrf.mxu1 }
  0xe2   :  { %v485_v57 = vadd.f32 %v484_v53, %v483_v51  ;;  %v876_v58 = vpop.f32.mrf.mxu0 }
  0xe3   :  { %v877_v60 = vadd.f32 %v876_v58, %v803_v56  ;;  %v948_v63 = vpop.f32.mrf.mxu1 }
  0xe4   :  { %v486_v61 = vrot.slane %v485_v57, 2  ;;  %v1081_v62 = vpop.f32.mrf.mxu0 }
  0xe5   :  { %v949_v1 = vadd.f32 %v948_v63, %v877_v60  ;;  %v1086_v3 = vpop.f32.mrf.mxu1 }
  0xe6   :  { %v487_v2 = vadd.f32 %v486_v61, %v485_v57 }
  0xe7   :  { %v954_v4 = vsub.f32 %v949_v1, %v1001_v0 }
  0xe8   :  { %v488_v5 = vrot.slane %v487_v2, 1 }
  0xe9   :  { %v955_v6 = vmul.f32 %v954_v4, %v954_v4 }
  0xea   :  { %v489_v7 = vadd.f32 %v488_v5, %v487_v2 }
  0xeb   :  { %v956_v8 = vsel %vm482_vm3, %v955_v6, 0.0 }
  0xec   :  { %1093 = vrsqrt.f32 %v489_v7  ;;  %v957_v9 = vrot.slane %v956_v8, 4  ;;  %vm494_vm5 = vcmp.eq.f32.partialorder %v489_v7, inf  ;;  %v497_v18 = vand.u32 2147483648, %v489_v7 }
  0xed   :  { %vm496_vm6 = vcmp.eq.f32.partialorder %v489_v7, 0.0 }
  0xee   :  { %v958_v10 = vadd.f32 %v957_v9, %v956_v8 }
  0xf0   :  { %v959_v11 = vrot.slane %v958_v10, 2 }
  0xf2   :  { %v960_v12 = vadd.f32 %v959_v11, %v958_v10 }
  0xf4   :  { %v961_v13 = vrot.slane %v960_v12, 1 }
  0xf6   :  { %v962_v14 = vadd.f32 %v961_v13, %v960_v12 }
  0xf8   :  { %1095 = vrsqrt.f32 %v962_v14  ;;  %vm968_vm8 = vcmp.eq.f32.partialorder %v962_v14, inf  ;;  %v971_v25 = vand.u32 2147483648, %v962_v14  ;;  %vm970_vm9 = vcmp.eq.f32.partialorder %v962_v14, 0.0 }
  0xf9   :  { %v1094_v16 = vpop.eup %1093 }
  0xfa   :  { %v493_v17 = vmul.f32 %v1094_v16, %v489_v7 }
  0xfc   :  { %v495_v19 = vsel %vm494_vm5, %v489_v7, %v493_v17 }
  0xfd   :  { %v498_v20 = vsel %vm496_vm6, %v497_v18, %v495_v19 }
  0xfe   :  { %v499_v21 = vsel %vm491_vm4, %v498_v20, 0.0 }
  0xff   :  { %500 = vst [vmem:[#allocation2] sm:$0x1] %v499_v21 }
 0x105   :  { %v1096_v23 = vpop.eup %1095 }
 0x106   :  { %v967_v24 = vmul.f32 %v1096_v23, %v962_v14 }
 0x108   :  { %v969_v26 = vsel %vm968_vm8, %v962_v14, %v967_v24 }
 0x109   :  { %v972_v27 = vsel %vm970_vm9, %v971_v25, %v969_v26 }
 0x10a   :  { %v973_v28 = vsel %vm965_vm7, %v972_v27, 0.0 }
 0x10b   :  { %975 = vst [vmem:[#allocation2 + $0x1] sm:$0x1] %v973_v28 }
 0x10c   :  { %1108 = shalt.err (!%p1105_p4)
}
 0x10d   :  { %s1123_s3 = smov 16   ;;  %s1124_s29 = smov 1  }
 0x10e   :  { %987 = dma.vmem_to_hbm [thread:$0]  %s982_s27, 32, %s1235_s4, [#allocation3], %s1123_s3, %s1123_s3, %s1124_s29  }
 0x10f   :  { %1117 = dma.done.wait [#allocation3], 32  }
 0x110   :  { %1118 = vsyncadd [#allocation3], 4294967264 }
 0x111   :  { %991 = vsyncpa [#allocation3], 1 }

</bundles_post_ra>
